<compile_context>
chip_gen: v5e
topology: v5e:2x2
jax: 0.10.0
libtpu: 0.0.40
codegen_flags: <defaults>
</compile_context>

<pallas_src>
import jax
import jax.numpy as jnp
from jax import lax
from jax.experimental import pallas as pl
from jax.experimental.pallas import tpu as pltpu


def rnn_kernel(x_ref, w_ih_ref, w_ho_ref, b_ref, y_ref, h_ref):
    """One grid step processes a chunk of Tt timesteps.

    x_ref    : (Tt, D_in)            f32, streamed per chunk
    w_ih_ref : (D_in, Hp)            W_ih^T, lane-padded, bf16, resident
    w_ho_ref : (Hp, Hp + Op)         [W_hh^T | W_out^T], lane-padded, bf16, resident
    b_ref    : (2, max(Hp, Op))      f32: row 0 = b_ih + b_hh, row 1 = b_out
    y_ref    : (1, Op)               f32 padded head output (resident across grid)
    h_ref    : (1, Hp)               f32 VMEM scratch, hidden state carried across chunks
    """
    t = pl.program_id(0)
    tt = x_ref.shape[0]
    hp = w_ih_ref.shape[1]
    op = w_ho_ref.shape[1] - hp

    @pl.when(t == 0)
    def _init():
        h_ref[...] = jnp.zeros_like(h_ref)

    # Chunk input projection: bf16 MXU operands, f32 accumulation, fused bias.
    xw = jnp.dot(x_ref[...].astype(jnp.bfloat16), w_ih_ref[...],
                 preferred_element_type=jnp.float32) + b_ref[0:1, :hp]

    # Static, 128-lane-aligned slice of the packed weight (no copy).
    w_hh = w_ho_ref[:, :hp]                                     # (Hp, Hp) bf16

    # Recurrence within the chunk, statically unrolled (Tt is small & static).
    # Padded lanes stay 0: zero-padded W_ih/W_hh columns + zero bias pad + tanh(0)=0.
    h = h_ref[...]                                              # (1, Hp) f32
    for i in range(tt):
        h = jnp.tanh(xw[i:i + 1, :] +
                     jnp.dot(h.astype(jnp.bfloat16), w_hh,
                             preferred_element_type=jnp.float32))
    h_ref[...] = h

    @pl.when(t == pl.num_programs(0) - 1)
    def _head():
        # w_out load bound to the epilogue: not live across the recurrence.
        w_out = w_ho_ref[:, hp:hp + op]                         # (Hp, Op) bf16
        h_last = h_ref[...]
        y = jnp.dot(h_last.astype(jnp.bfloat16), w_out,
                    preferred_element_type=jnp.float32) + b_ref[1:2, :op]
        y_ref[...] = y.astype(y_ref.dtype)                      # lane-dense store


def _round_up(n, m):
    return ((n + m - 1) // m) * m


def _pick_chunk(seq_len, max_chunk=32):
    """Largest divisor of seq_len that is a multiple of 8 and <= max_chunk;
    fall back to the full sequence (block == full dim is always legal)."""
    best = None
    for c in range(8, min(seq_len, max_chunk) + 1, 8):
        if seq_len % c == 0:
            best = c
    return best if best is not None else seq_len


def rnn_forward(x, w_ih, w_hh, b_ih, b_hh, w_lin, b_lin):
    """Forward of the module. Params in PyTorch layout:
    w_ih (H, D_in), w_hh (H, H), b_ih/b_hh (H,), w_lin (D_out, H), b_lin (D_out,).
    Returns y_pred[-1] of shape (1, D_out)."""
    seq_len, d_in = x.shape
    d_hidden = w_hh.shape[0]
    d_out = w_lin.shape[0]
    hp = _round_up(d_hidden, 128)   # lane-pad hidden dim
    op = _round_up(d_out, 128)      # lane-pad output dim
    bp = max(hp, op)

    def pad2(a, rows, cols):
        return jnp.pad(a, ((0, rows - a.shape[0]), (0, cols - a.shape[1])))

    # bf16 MXU operands; zero pads are exact in bf16 so the padded-lane
    # invariant still holds.  Biases stay f32 (added post-accumulation).
    w_ih_p = pad2(w_ih.T, d_in, hp).astype(jnp.bfloat16)              # (D_in, Hp)
    w_ho = jnp.concatenate(
        [pad2(w_hh.T, hp, hp), pad2(w_lin.T, hp, op)],
        axis=1).astype(jnp.bfloat16)                                  # (Hp, Hp+Op)
    b = jnp.stack([jnp.pad(b_ih + b_hh, (0, bp - d_hidden)),
                   jnp.pad(b_lin, (0, bp - d_out))],
                  axis=0).astype(jnp.float32)                         # (2, Bp)

    tt = _pick_chunk(seq_len)
    num_chunks = seq_len // tt

    flops = 2 * seq_len * d_in * hp + 2 * seq_len * hp * hp + 2 * hp * op
    bytes_accessed = (4 * x.size + 2 * (w_ih_p.size + w_ho.size)
                      + 4 * b.size + 4 * op)

    grid_spec = pltpu.PrefetchScalarGridSpec(
        num_scalar_prefetch=0,
        grid=(num_chunks,),
        in_specs=[
            pl.BlockSpec((tt, d_in), lambda t: (t, 0)),        # x, streamed
            pl.BlockSpec((d_in, hp), lambda t: (0, 0)),        # W_ih^T, resident
            pl.BlockSpec((hp, hp + op), lambda t: (0, 0)),     # [W_hh^T|W_out^T]
            pl.BlockSpec((2, bp), lambda t: (0, 0)),           # biases
        ],
        out_specs=pl.BlockSpec((1, op), lambda t: (0, 0)),     # resident accumulator
        scratch_shapes=[pltpu.VMEM((1, hp), jnp.float32)],     # hidden state carry
    )

    y_pad = pl.pallas_call(
        rnn_kernel,
        out_shape=jax.ShapeDtypeStruct((1, op), jnp.float32),
        grid_spec=grid_spec,
        compiler_params=pltpu.CompilerParams(
            dimension_semantics=("arbitrary",)),               # serial recurrence
        cost_estimate=pl.CostEstimate(flops=flops,
                                      transcendentals=seq_len * hp,
                                      bytes_accessed=bytes_accessed),
    )(x.astype(jnp.float32), w_ih_p, w_ho, b)
    return y_pad[:, :d_out]


def rnn_forward_ref(x, w_ih, w_hh, b_ih, b_hh, w_lin, b_lin):
    """Pure-JAX f32 reference matching torch.nn.RNN(tanh) + Linear, last step only."""
    h0 = jnp.zeros((1, w_hh.shape[0]), jnp.float32)

    def step(h, x_t):
        h_new = jnp.tanh(x_t[None, :] @ w_ih.T + b_ih + h @ w_hh.T + b_hh)
        return h_new, None

    h_last, _ = lax.scan(step, h0, x)
    return h_last @ w_lin.T + b_lin


if __name__ == "__main__":
    # Shapes consistent with the module's forward (batch=1 internal, squeezed).
    seq_len, D_in, D_hidden, D_out = 8, 16, 32, 8

    key = jax.random.PRNGKey(0)
    k_x, k_wih, k_whh, k_bih, k_bhh, k_wo, k_bo = jax.random.split(key, 7)

    # Deterministic PyTorch-layout params, U(-1/sqrt(H), 1/sqrt(H)) init.
    bound = 1.0 / float(jnp.sqrt(jnp.float32(D_hidden)))
    w_ih = jax.random.uniform(k_wih, (D_hidden, D_in), jnp.float32, -bound, bound)
    w_hh = jax.random.uniform(k_whh, (D_hidden, D_hidden), jnp.float32, -bound, bound)
    b_ih = jax.random.uniform(k_bih, (D_hidden,), jnp.float32, -bound, bound)
    b_hh = jax.random.uniform(k_bhh, (D_hidden,), jnp.float32, -bound, bound)
    w_lin = jax.random.uniform(k_wo, (D_out, D_hidden), jnp.float32, -bound, bound)
    b_lin = jax.random.uniform(k_bo, (D_out,), jnp.float32, -bound, bound)

    x = jax.random.normal(k_x, (seq_len, D_in), jnp.float32)

    y = rnn_forward(x, w_ih, w_hh, b_ih, b_hh, w_lin, b_lin)
    y = jax.block_until_ready(y)

    y_ref = rnn_forward_ref(x, w_ih, w_hh, b_ih, b_hh, w_lin, b_lin)
    assert y.shape == (1, D_out), y.shape
    # bf16 MXU operands (f32 accumulation, f32 hidden state): tolerance loosened
    # vs. the all-f32 version per review; serial recurrence compounds rounding.
    assert jnp.allclose(y, y_ref, atol=5e-2, rtol=5e-2), (y, y_ref)

    print("KERNEL_OK")
</pallas_src>

<mosaic_0001>
module attributes {stable_mosaic.version = 11 : i64} {
  func.func @rnn_kernel(%arg0: i32, %arg1: memref<8x16xf32, #tpu.memory_space<vmem>>, %arg2: memref<16x128xbf16, #tpu.memory_space<vmem>>, %arg3: memref<128x256xbf16, #tpu.memory_space<vmem>>, %arg4: memref<2x128xf32, #tpu.memory_space<vmem>>, %arg5: memref<1x128xf32, #tpu.memory_space<vmem>>, %arg6: memref<1x128xf32, #tpu.memory_space<vmem>>) attributes {dimension_semantics = [#tpu.dimension_semantics<arbitrary>], iteration_bounds = array<i64: 1>, scalar_prefetch = 0 : i64, scratch_operands = 1 : i64, tpu.core_type = #tpu.core_type<tc>, window_params = [{transform_indices = @transform_0, window_bounds = array<i64: 8, 16>}, {pipeline_mode = #tpu.pipeline_mode<synchronous>, transform_indices = @transform_1, window_bounds = array<i64: 16, 128>}, {pipeline_mode = #tpu.pipeline_mode<synchronous>, transform_indices = @transform_2, window_bounds = array<i64: 128, 256>}, {pipeline_mode = #tpu.pipeline_mode<synchronous>, transform_indices = @transform_3, window_bounds = array<i64: 2, 128>}, {pipeline_mode = #tpu.pipeline_mode<synchronous>, transform_indices = @transform_4, window_bounds = array<i64: 1, 128>}]} {
    %c0_i32 = arith.constant 0 : i32
    %0 = arith.cmpi eq, %arg0, %c0_i32 : i32
    %1 = arith.extui %0 : i1 to i32
    %c0_i32_0 = arith.constant 0 : i32
    %2 = arith.cmpi ne, %1, %c0_i32_0 : i32
    scf.if %2 {
      %cst_22 = arith.constant 0.000000e+00 : f32
      %56 = vector.broadcast %cst_22 : f32 to vector<1x128xf32>
      %c0_23 = arith.constant 0 : index
      %c0_24 = arith.constant 0 : index
      %57 = vector.load %arg6[%c0_23, %c0_24] : memref<1x128xf32, #tpu.memory_space<vmem>>, vector<1x128xf32>
      tpu.vector_store %arg6[%c0_23, %c0_24], %56 {strides = array<i32>} : memref<1x128xf32, #tpu.memory_space<vmem>>, vector<1x128xf32>,
    } else {
    }
    %c0 = arith.constant 0 : index
    %c0_1 = arith.constant 0 : index
    %3 = vector.load %arg1[%c0, %c0_1] : memref<8x16xf32, #tpu.memory_space<vmem>>, vector<8x16xf32>
    %4 = arith.truncf %3 : vector<8x16xf32> to vector<8x16xbf16>
    %c0_2 = arith.constant 0 : index
    %c0_3 = arith.constant 0 : index
    %5 = vector.load %arg2[%c0_2, %c0_3] : memref<16x128xbf16, #tpu.memory_space<vmem>>, vector<16x128xbf16>
    %cst = arith.constant dense<0.000000e+00> : vector<8x128xf32>
    %6 = tpu.matmul %4, %5, %cst {dimension_numbers = #tpu.dot_dimension_numbers<[1], [0], [0], [1], [0, 0, 1, 1], [], []>} : vector<8x16xbf16>, vector<16x128xbf16>, vector<8x128xf32> -> vector<8x128xf32>
    %c0_4 = arith.constant 0 : index
    %c0_5 = arith.constant 0 : index
    %7 = vector.load %arg4[%c0_4, %c0_5] : memref<2x128xf32, #tpu.memory_space<vmem>>, vector<1x128xf32>
    %8 = vector.broadcast %7 : vector<1x128xf32> to vector<8x128xf32>
    %9 = arith.addf %6, %8 : vector<8x128xf32>
    %c0_6 = arith.constant 0 : index
    %c0_7 = arith.constant 0 : index
    %10 = vector.load %arg3[%c0_6, %c0_7] : memref<128x256xbf16, #tpu.memory_space<vmem>>, vector<128x128xbf16>
    %c0_8 = arith.constant 0 : index
    %c0_9 = arith.constant 0 : index
    %11 = vector.load %arg6[%c0_8, %c0_9] : memref<1x128xf32, #tpu.memory_space<vmem>>, vector<1x128xf32>
    %12 = vector.extract_strided_slice %9 {offsets = [0, 0], sizes = [1, 128], strides = [1, 1]} : vector<8x128xf32> to vector<1x128xf32>
    %13 = arith.truncf %11 : vector<1x128xf32> to vector<1x128xbf16>
    %cst_10 = arith.constant dense<0.000000e+00> : vector<1x128xf32>
    %14 = tpu.matmul %13, %10, %cst_10 {dimension_numbers = #tpu.dot_dimension_numbers<[1], [0], [0], [1], [0, 0, 1, 1], [], []>} : vector<1x128xbf16>, vector<128x128xbf16>, vector<1x128xf32> -> vector<1x128xf32>
    %15 = arith.addf %12, %14 : vector<1x128xf32>
    %16 = math.tanh %15 : vector<1x128xf32>
    %17 = vector.extract_strided_slice %9 {offsets = [1, 0], sizes = [1, 128], strides = [1, 1]} : vector<8x128xf32> to vector<1x128xf32>
    %18 = arith.truncf %16 : vector<1x128xf32> to vector<1x128xbf16>
    %cst_11 = arith.constant dense<0.000000e+00> : vector<1x128xf32>
    %19 = tpu.matmul %18, %10, %cst_11 {dimension_numbers = #tpu.dot_dimension_numbers<[1], [0], [0], [1], [0, 0, 1, 1], [], []>} : vector<1x128xbf16>, vector<128x128xbf16>, vector<1x128xf32> -> vector<1x128xf32>
    %20 = arith.addf %17, %19 : vector<1x128xf32>
    %21 = math.tanh %20 : vector<1x128xf32>
    %22 = vector.extract_strided_slice %9 {offsets = [2, 0], sizes = [1, 128], strides = [1, 1]} : vector<8x128xf32> to vector<1x128xf32>
    %23 = arith.truncf %21 : vector<1x128xf32> to vector<1x128xbf16>
    %cst_12 = arith.constant dense<0.000000e+00> : vector<1x128xf32>
    %24 = tpu.matmul %23, %10, %cst_12 {dimension_numbers = #tpu.dot_dimension_numbers<[1], [0], [0], [1], [0, 0, 1, 1], [], []>} : vector<1x128xbf16>, vector<128x128xbf16>, vector<1x128xf32> -> vector<1x128xf32>
    %25 = arith.addf %22, %24 : vector<1x128xf32>
    %26 = math.tanh %25 : vector<1x128xf32>
    %27 = vector.extract_strided_slice %9 {offsets = [3, 0], sizes = [1, 128], strides = [1, 1]} : vector<8x128xf32> to vector<1x128xf32>
    %28 = arith.truncf %26 : vector<1x128xf32> to vector<1x128xbf16>
    %cst_13 = arith.constant dense<0.000000e+00> : vector<1x128xf32>
    %29 = tpu.matmul %28, %10, %cst_13 {dimension_numbers = #tpu.dot_dimension_numbers<[1], [0], [0], [1], [0, 0, 1, 1], [], []>} : vector<1x128xbf16>, vector<128x128xbf16>, vector<1x128xf32> -> vector<1x128xf32>
    %30 = arith.addf %27, %29 : vector<1x128xf32>
    %31 = math.tanh %30 : vector<1x128xf32>
    %32 = vector.extract_strided_slice %9 {offsets = [4, 0], sizes = [1, 128], strides = [1, 1]} : vector<8x128xf32> to vector<1x128xf32>
    %33 = arith.truncf %31 : vector<1x128xf32> to vector<1x128xbf16>
    %cst_14 = arith.constant dense<0.000000e+00> : vector<1x128xf32>
    %34 = tpu.matmul %33, %10, %cst_14 {dimension_numbers = #tpu.dot_dimension_numbers<[1], [0], [0], [1], [0, 0, 1, 1], [], []>} : vector<1x128xbf16>, vector<128x128xbf16>, vector<1x128xf32> -> vector<1x128xf32>
    %35 = arith.addf %32, %34 : vector<1x128xf32>
    %36 = math.tanh %35 : vector<1x128xf32>
    %37 = vector.extract_strided_slice %9 {offsets = [5, 0], sizes = [1, 128], strides = [1, 1]} : vector<8x128xf32> to vector<1x128xf32>
    %38 = arith.truncf %36 : vector<1x128xf32> to vector<1x128xbf16>
    %cst_15 = arith.constant dense<0.000000e+00> : vector<1x128xf32>
    %39 = tpu.matmul %38, %10, %cst_15 {dimension_numbers = #tpu.dot_dimension_numbers<[1], [0], [0], [1], [0, 0, 1, 1], [], []>} : vector<1x128xbf16>, vector<128x128xbf16>, vector<1x128xf32> -> vector<1x128xf32>
    %40 = arith.addf %37, %39 : vector<1x128xf32>
    %41 = math.tanh %40 : vector<1x128xf32>
    %42 = vector.extract_strided_slice %9 {offsets = [6, 0], sizes = [1, 128], strides = [1, 1]} : vector<8x128xf32> to vector<1x128xf32>
    %43 = arith.truncf %41 : vector<1x128xf32> to vector<1x128xbf16>
    %cst_16 = arith.constant dense<0.000000e+00> : vector<1x128xf32>
    %44 = tpu.matmul %43, %10, %cst_16 {dimension_numbers = #tpu.dot_dimension_numbers<[1], [0], [0], [1], [0, 0, 1, 1], [], []>} : vector<1x128xbf16>, vector<128x128xbf16>, vector<1x128xf32> -> vector<1x128xf32>
    %45 = arith.addf %42, %44 : vector<1x128xf32>
    %46 = math.tanh %45 : vector<1x128xf32>
    %47 = vector.extract_strided_slice %9 {offsets = [7, 0], sizes = [1, 128], strides = [1, 1]} : vector<8x128xf32> to vector<1x128xf32>
    %48 = arith.truncf %46 : vector<1x128xf32> to vector<1x128xbf16>
    %cst_17 = arith.constant dense<0.000000e+00> : vector<1x128xf32>
    %49 = tpu.matmul %48, %10, %cst_17 {dimension_numbers = #tpu.dot_dimension_numbers<[1], [0], [0], [1], [0, 0, 1, 1], [], []>} : vector<1x128xbf16>, vector<128x128xbf16>, vector<1x128xf32> -> vector<1x128xf32>
    %50 = arith.addf %47, %49 : vector<1x128xf32>
    %51 = math.tanh %50 : vector<1x128xf32>
    %c0_18 = arith.constant 0 : index
    %c0_19 = arith.constant 0 : index
    %52 = vector.load %arg6[%c0_18, %c0_19] : memref<1x128xf32, #tpu.memory_space<vmem>>, vector<1x128xf32>
    tpu.vector_store %arg6[%c0_18, %c0_19], %51 {strides = array<i32>} : memref<1x128xf32, #tpu.memory_space<vmem>>, vector<1x128xf32>,
    %c0_i32_20 = arith.constant 0 : i32
    %53 = arith.cmpi eq, %arg0, %c0_i32_20 : i32
    %54 = arith.extui %53 : i1 to i32
    %c0_i32_21 = arith.constant 0 : i32
    %55 = arith.cmpi ne, %54, %c0_i32_21 : i32
    scf.if %55 {
      %c0_22 = arith.constant 0 : index
      %c128 = arith.constant 128 : index
      %56 = vector.load %arg3[%c0_22, %c128] : memref<128x256xbf16, #tpu.memory_space<vmem>>, vector<128x128xbf16>
      %c0_23 = arith.constant 0 : index
      %c0_24 = arith.constant 0 : index
      %57 = vector.load %arg6[%c0_23, %c0_24] : memref<1x128xf32, #tpu.memory_space<vmem>>, vector<1x128xf32>
      %58 = arith.truncf %57 : vector<1x128xf32> to vector<1x128xbf16>
      %cst_25 = arith.constant dense<0.000000e+00> : vector<1x128xf32>
      %59 = tpu.matmul %58, %56, %cst_25 {dimension_numbers = #tpu.dot_dimension_numbers<[1], [0], [0], [1], [0, 0, 1, 1], [], []>} : vector<1x128xbf16>, vector<128x128xbf16>, vector<1x128xf32> -> vector<1x128xf32>
      %c1 = arith.constant 1 : index
      %c0_26 = arith.constant 0 : index
      %60 = vector.load %arg4[%c1, %c0_26] : memref<2x128xf32, #tpu.memory_space<vmem>>, vector<1x128xf32>
      %61 = arith.addf %59, %60 : vector<1x128xf32>
      %c0_27 = arith.constant 0 : index
      %c0_28 = arith.constant 0 : index
      %62 = vector.load %arg5[%c0_27, %c0_28] : memref<1x128xf32, #tpu.memory_space<vmem>>, vector<1x128xf32>
      tpu.vector_store %arg5[%c0_27, %c0_28], %61 {strides = array<i32>} : memref<1x128xf32, #tpu.memory_space<vmem>>, vector<1x128xf32>,
    } else {
    }
    return
  }
  func.func @transform_0(%arg0: i32) -> (i32, i32) {
    %c0_i32 = arith.constant 0 : i32
    %c0_i32_0 = arith.constant 0 : i32
    return %arg0, %c0_i32 : i32, i32
  }
  func.func @transform_1(%arg0: i32) -> (i32, i32) {
    %c0_i32 = arith.constant 0 : i32
    %c0_i32_0 = arith.constant 0 : i32
    %c0_i32_1 = arith.constant 0 : i32
    return %c0_i32, %c0_i32_0 : i32, i32
  }
  func.func @transform_2(%arg0: i32) -> (i32, i32) {
    %c0_i32 = arith.constant 0 : i32
    %c0_i32_0 = arith.constant 0 : i32
    %c0_i32_1 = arith.constant 0 : i32
    return %c0_i32, %c0_i32_0 : i32, i32
  }
  func.func @transform_3(%arg0: i32) -> (i32, i32) {
    %c0_i32 = arith.constant 0 : i32
    %c0_i32_0 = arith.constant 0 : i32
    %c0_i32_1 = arith.constant 0 : i32
    return %c0_i32, %c0_i32_0 : i32, i32
  }
  func.func @transform_4(%arg0: i32) -> (i32, i32) {
    %c0_i32 = arith.constant 0 : i32
    %c0_i32_0 = arith.constant 0 : i32
    %c0_i32_1 = arith.constant 0 : i32
    return %c0_i32, %c0_i32_0 : i32, i32
  }
}

</mosaic_0001>

<bundles_post_ra>
// kernel: tpu_custom_call.1
= control target key start
LH: loop header
LB: loop body
LE: loop exit
PB: predicated region body
PF: predicated region fallthrough
CT: control target
= control target key end

     0   :  { %9 = vsyncpa [#allocation4], 0  ;;  %s734_s0 = inlined_call_operand.hbm [shape: f32[8,16], index: 0, kind: input, shape index: {}]   ;;  %s735_s1 = inlined_call_operand.hbm [shape: bf16[16,128], index: 1, kind: input, shape index: {}]   ;;  %s736_s2 = inlined_call_operand.hbm [shape: bf16[128,256], index: 2, kind: input, shape index: {}]   ;;  %s737_s3 = inlined_call_operand.vmem [shape: f32[2,128], index: 3, kind: input, shape index: {}]   ;;  %s738_s4 = inlined_call_operand.hbm [shape: f32[1,128], index: 4, kind: output, shape index: {}]  }
   0x1   :  { %10 = vsyncpa [#allocation7], 0  ;;  %s27_s17 = sshll.u32 %s735_s1, 4  ;;  %s28_s17 = int_to_ptr.hbm [resolvable:$true] %s27_s17 }
   0x2   :  { %11 = vsyncpa [#allocation5], 0  ;;  %s652_s18 = smov [#allocation6]   ;;  %s17_s22 = sshll.u32 %s734_s0, 4  ;;  %s18_s22 = int_to_ptr.hbm [resolvable:$true] %s17_s22 }
   0x3   :  { %s29_s19 = sshll.u32 %s652_s18, 4  ;;  %s653_s23 = smov 64   ;;  %s30_s19 = int_to_ptr.vmem [resolvable:$true] %s29_s19 }
   0x4   :  { %s654_s24 = smov 4   ;;  %s655_s25 = smov [#allocation3]  }
   0x5   :  { %35 = dma.hbm_to_vmem [thread:$0]  %s28_s17, 128, %s30_s19, [#allocation7], %s653_s23, %s653_s23, %s654_s24  }
   0x6   :  { %s19_s26 = sshll.u32 %s655_s25, 4  ;;  %s40_s29 = sshll.u32 %s736_s2, 4  ;;  %s20_s26 = int_to_ptr.vmem [resolvable:$true] %s19_s26  ;;  %s41_s29 = int_to_ptr.hbm [resolvable:$true] %s40_s29 }
   0x7   :  { %22 = dma.hbm_to_vmem [thread:$0]  %s18_s22, 128, %s20_s26, [#allocation4]  }
   0x8   :  { %s656_s1 = smov [#allocation8]   ;;  %s657_s5 = smov 128  }
   0x9   :  { %s42_s30 = sshll.u32 %s656_s1, 4  ;;  %s658_s6 = smov 8   ;;  %s43_s30 = int_to_ptr.vmem [resolvable:$true] %s42_s30 }
   0xa   :  { %48 = dma.hbm_to_vmem [thread:$0]  %s41_s29, 2048, %s43_s30, [#allocation7], %s657_s5, %s657_s5, %s658_s6  }
   0xb   :  { %646 = dma.done.wait [#allocation4], 128  }
   0xc   :  { %647 = vsyncadd [#allocation4], 4294967168 }
   0xd   :  { %648 = dma.done.wait [#allocation7], 2176  }
   0xe   :  { %649 = vsyncadd [#allocation7], 4294965120  ;;  %v659_v0 = vmov 0.0   ;;  %v473_v1 = vld [vmem:[#allocation8 + $0x70] sm:$0xf]  ;;  %v507_v7 = vld [vmem:[#allocation6] sm:$0xff] }
   0xf   :  { %68 = vst [vmem:[#allocation2] sm:$0x1] %v659_v0  ;;  %v515_v2 = vld [vmem:[#allocation8 + $0x74] sm:$0xf0]  ;;  %v469_v3 = vld [vmem:[#allocation8 + $0x60] sm:$0xf]  ;;  %92 = vmatpush.bf16.msra.mxu0 %v507_v7 }
  0x10   :  { %v695_v4 = vor.u32 %v515_v2, %v473_v1  ;;  %v514_v5 = vld [vmem:[#allocation8 + $0x64] sm:$0xf0]  ;;  %v465_v8 = vld [vmem:[#allocation8 + $0x50] sm:$0xf]  ;;  %v513_v9 = vld [vmem:[#allocation8 + $0x54] sm:$0xf0] }
  0x11   :  { %v698_v6 = vor.u32 %v514_v5, %v469_v3  ;;  %v69_v10 = vld [vmem:[#allocation3] sm:$0xff]  ;;  %vm81_vm0 = vcmask 130048   ;;  %v466_v12 = vor.u32 %v513_v9, %v465_v8  ;;  %v461_v13 = vld [vmem:[#allocation8 + $0x40] sm:$0xf]  ;;  %v512_v14 = vld [vmem:[#allocation8 + $0x44] sm:$0xf0] }
  0x12   :  { %164 = vmatpush.bf16.msra.mxu1 %v695_v4  ;;  %180 = vmatpush.bf16.msra.mxu2 %v695_v4  ;;  %v70_v11 = vpack.c.bf16 %v69_v10, %v69_v10  ;;  %v462_v15 = vor.u32 %v512_v14, %v461_v13  ;;  %v457_v16 = vld [vmem:[#allocation8 + $0x30] sm:$0xf]  ;;  %v511_v17 = vld [vmem:[#allocation8 + $0x34] sm:$0xf0]  ;;  %v453_v19 = vld [vmem:[#allocation8 + $0x20] sm:$0xf] }
  0x13   :  { %203 = vmatpush.bf16.msra.mxu3 %v695_v4  ;;  %225 = vmatpush.bf16.msrb.mxu0 %v695_v4  ;;  %v458_v18 = vor.u32 %v511_v17, %v457_v16  ;;  %v510_v20 = vld [vmem:[#allocation8 + $0x24] sm:$0xf0]  ;;  %v449_v22 = vld [vmem:[#allocation8 + $0x10] sm:$0xf]  ;;  %v509_v23 = vld [vmem:[#allocation8 + $0x14] sm:$0xf0] }
  0x14   :  { %442 = vmatmul.msk.bf16.vlgmr.msra.gmra.mxu0 %vm81_vm0, %v70_v11  ;;  %v454_v21 = vor.u32 %v510_v20, %v453_v19  ;;  %v450_v24 = vor.u32 %v509_v23, %v449_v22  ;;  %v445_v25 = vld [vmem:[#allocation8] sm:$0xf]  ;;  %v508_v26 = vld [vmem:[#allocation8 + $0x4] sm:$0xf0]  ;;  %v533_v32 = vld [vmem:[%s737_s3] ss:$0 sm:$0xff] }
  0x15   :  { %v446_v27 = vor.u32 %v508_v26, %v445_v25  ;;  %v523_v13 = vld [vmem:[#allocation8 + $0x78] sm:$0xf0]  ;;  %v501_v14 = vld [vmem:[#allocation8 + $0x64] sm:$0xf]  ;;  %v522_v16 = vld [vmem:[#allocation8 + $0x68] sm:$0xf0] }
  0x16   :  { %165 = vmatpush.bf16.msra.mxu1 %v698_v6  ;;  %181 = vmatpush.bf16.msra.mxu2 %v698_v6  ;;  %v114_v28 = vld [vmem:[#allocation2] sm:$0x1]  ;;  %v502_v17 = vor.u32 %v522_v16, %v501_v14  ;;  %v521_v19 = vld [vmem:[#allocation8 + $0x58] sm:$0xf0]  ;;  %s660_s9 = smov [#allocation9]   ;;  %s427_s13 = sshll.u32 %s738_s4, 4  ;;  %s428_s13 = int_to_ptr.hbm [resolvable:$true] %s427_s13 }
  0x17   :  { %204 = vmatpush.bf16.msra.mxu3 %v698_v6  ;;  %226 = vmatpush.bf16.msrb.mxu0 %v698_v6  ;;  %v115_v29 = vpack.c.bf16 %v114_v28, %v114_v28  ;;  %v493_v28 = vld [vmem:[#allocation8 + $0x44] sm:$0xf]  ;;  %s425_s10 = sshll.u32 %s660_s9, 4  ;;  %s426_s10 = int_to_ptr.vmem [resolvable:$true] %s425_s10 }
  0x1a   :  { %166 = vmatpush.bf16.msra.mxu1 %v466_v12  ;;  %182 = vmatpush.bf16.msra.mxu2 %v466_v12 }
  0x1b   :  { %205 = vmatpush.bf16.msra.mxu3 %v466_v12  ;;  %227 = vmatpush.bf16.msrb.mxu0 %v466_v12 }
  0x1e   :  { %167 = vmatpush.bf16.msra.mxu1 %v462_v15  ;;  %183 = vmatpush.bf16.msra.mxu2 %v462_v15 }
  0x1f   :  { %206 = vmatpush.bf16.msra.mxu3 %v462_v15  ;;  %228 = vmatpush.bf16.msrb.mxu0 %v462_v15 }
  0x22   :  { %168 = vmatpush.bf16.msra.mxu1 %v458_v18  ;;  %184 = vmatpush.bf16.msra.mxu2 %v458_v18 }
  0x23   :  { %207 = vmatpush.bf16.msra.mxu3 %v458_v18  ;;  %229 = vmatpush.bf16.msrb.mxu0 %v458_v18 }
  0x26   :  { %169 = vmatpush.bf16.msra.mxu1 %v454_v21  ;;  %185 = vmatpush.bf16.msra.mxu2 %v454_v21 }
  0x27   :  { %208 = vmatpush.bf16.msra.mxu3 %v454_v21  ;;  %230 = vmatpush.bf16.msrb.mxu0 %v454_v21 }
  0x2a   :  { %170 = vmatpush.bf16.msra.mxu1 %v450_v24  ;;  %186 = vmatpush.bf16.msra.mxu2 %v450_v24 }
  0x2b   :  { %209 = vmatpush.bf16.msra.mxu3 %v450_v24  ;;  %231 = vmatpush.bf16.msrb.mxu0 %v450_v24 }
  0x2e   :  { %171 = vmatpush.bf16.msra.mxu1 %v446_v27  ;;  %187 = vmatpush.bf16.msra.mxu2 %v446_v27 }
  0x2f   :  { %210 = vmatpush.bf16.msra.mxu3 %v446_v27  ;;  %232 = vmatpush.bf16.msrb.mxu0 %v446_v27 }
  0x31   :  { %172 = vmatmul.bf16.vlgmr.msra.gmra.mxu1 %v115_v29  ;;  %v520_v29 = vld [vmem:[#allocation8 + $0x48] sm:$0xf0] }
  0x32   :  { %249 = vmatpush.bf16.msrb.mxu1 %v695_v4  ;;  %271 = vmatpush.bf16.msrb.mxu2 %v695_v4 }
  0x33   :  { %295 = vmatpush.bf16.msrb.mxu3 %v695_v4  ;;  %317 = vmatpush.bf16.msra.mxu0 %v695_v4 }
  0x36   :  { %250 = vmatpush.bf16.msrb.mxu1 %v698_v6  ;;  %272 = vmatpush.bf16.msrb.mxu2 %v698_v6 }
  0x37   :  { %296 = vmatpush.bf16.msrb.mxu3 %v698_v6  ;;  %318 = vmatpush.bf16.msra.mxu0 %v698_v6 }
  0x3a   :  { %251 = vmatpush.bf16.msrb.mxu1 %v466_v12  ;;  %273 = vmatpush.bf16.msrb.mxu2 %v466_v12 }
  0x3b   :  { %297 = vmatpush.bf16.msrb.mxu3 %v466_v12  ;;  %319 = vmatpush.bf16.msra.mxu0 %v466_v12  ;;  %v505_v12 = vld [vmem:[#allocation8 + $0x74] sm:$0xf] }
  0x3e   :  { %252 = vmatpush.bf16.msrb.mxu1 %v462_v15  ;;  %274 = vmatpush.bf16.msrb.mxu2 %v462_v15 }
  0x3f   :  { %298 = vmatpush.bf16.msrb.mxu3 %v462_v15  ;;  %320 = vmatpush.bf16.msra.mxu0 %v462_v15  ;;  %v506_v15 = vor.u32 %v523_v13, %v505_v12 }
  0x42   :  { %253 = vmatpush.bf16.msrb.mxu1 %v458_v18  ;;  %275 = vmatpush.bf16.msrb.mxu2 %v458_v18 }
  0x43   :  { %299 = vmatpush.bf16.msrb.mxu3 %v458_v18  ;;  %321 = vmatpush.bf16.msra.mxu0 %v458_v18  ;;  %v497_v18 = vld [vmem:[#allocation8 + $0x54] sm:$0xf] }
  0x44   :  { %v498_v20 = vor.u32 %v521_v19, %v497_v18 }
  0x46   :  { %254 = vmatpush.bf16.msrb.mxu1 %v454_v21  ;;  %276 = vmatpush.bf16.msrb.mxu2 %v454_v21 }
  0x47   :  { %300 = vmatpush.bf16.msrb.mxu3 %v454_v21  ;;  %322 = vmatpush.bf16.msra.mxu0 %v454_v21 }
  0x4a   :  { %255 = vmatpush.bf16.msrb.mxu1 %v450_v24  ;;  %277 = vmatpush.bf16.msrb.mxu2 %v450_v24 }
  0x4b   :  { %301 = vmatpush.bf16.msrb.mxu3 %v450_v24  ;;  %323 = vmatpush.bf16.msra.mxu0 %v450_v24 }
  0x4e   :  { %256 = vmatpush.bf16.msrb.mxu1 %v446_v27  ;;  %278 = vmatpush.bf16.msrb.mxu2 %v446_v27 }
  0x4f   :  { %302 = vmatpush.bf16.msrb.mxu3 %v446_v27  ;;  %324 = vmatpush.bf16.msra.mxu0 %v446_v27 }
  0x52   :  { %406 = vmatpush.bf16.msra.mxu1 %v506_v15 }
  0x56   :  { %407 = vmatpush.bf16.msra.mxu1 %v502_v17 }
  0x5a   :  { %408 = vmatpush.bf16.msra.mxu1 %v498_v20 }
  0x91   :  { %v94_v30 = vpop.f32.mrf.mxu0 }
  0x92   :  { %v718_v33 = vadd.f32 %v533_v32, %v94_v30  ;;  %v494_v30 = vor.u32 %v520_v29, %v493_v28  ;;  %v519_v32 = vld [vmem:[#allocation8 + $0x38] sm:$0xf0] }
  0x94   :  { %409 = vmatpush.bf16.msra.mxu1 %v494_v30 }
  0x99   :  { %v96_v31 = vpop.f32.mrf.mxu0 }
  0x9a   :  { %v489_v31 = vld [vmem:[#allocation8 + $0x34] sm:$0xf] }
  0xae   :  { %v173_v34 = vpop.f32.mrf.mxu1 }
  0xaf   :  { %v177_v35 = vadd.f32 %v173_v34, %v718_v33  ;;  %v490_v34 = vor.u32 %v519_v32, %v489_v31 }
  0xb1   :  { %534 = vtanh.f32 %v177_v35  ;;  %410 = vmatpush.bf16.msra.mxu1 %v490_v34  ;;  %v485_v35 = vld [vmem:[#allocation8 + $0x24] sm:$0xf] }
  0xb6   :  { %v175_v36 = vpop.f32.mrf.mxu1 }
  0xb7   :  { %v535_v37 = vpop.eup %534  ;;  %v518_v36 = vld [vmem:[#allocation8 + $0x28] sm:$0xf0] }
  0xb8   :  { %v179_v38 = vpack.c.bf16 %v535_v37, %v535_v37  ;;  %v486_v37 = vor.u32 %v518_v36, %v485_v35 }
  0xba   :  { %188 = vmatmul.bf16.vlgmr.msra.gmra.mxu2 %v179_v38  ;;  %411 = vmatpush.bf16.msra.mxu1 %v486_v37  ;;  %v481_v38 = vld [vmem:[#allocation8 + $0x14] sm:$0xf] }
 0x13d   :  { %v189_v39 = vpop.f32.mrf.mxu2 }
 0x13e   :  { %v194_v40 = vrot.slane %v189_v39, 7  ;;  %v517_v39 = vld [vmem:[#allocation8 + $0x18] sm:$0xf0] }
 0x140   :  { %v196_v41 = vadd.f32 %v194_v40, %v718_v33  ;;  %v477_v40 = vld [vmem:[#allocation8 + $0x4] sm:$0xf] }
 0x142   :  { %536 = vtanh.f32 %v196_v41  ;;  %v482_v41 = vor.u32 %v517_v39, %v481_v38 }
 0x144   :  { %412 = vmatpush.bf16.msra.mxu1 %v482_v41 }
 0x145   :  { %v191_v42 = vpop.f32.mrf.mxu2 }
 0x146   :  { %v516_v42 = vld [vmem:[#allocation8 + $0x8] sm:$0xf0] }
 0x148   :  { %v537_v43 = vpop.eup %536 }
 0x149   :  { %v198_v44 = vpack.c.bf16 %v537_v43, %v537_v43  ;;  %v478_v43 = vor.u32 %v516_v42, %v477_v40 }
 0x14b   :  { %v200_v45 = vshrl.u32 %v198_v44, 16  ;;  %413 = vmatpush.bf16.msra.mxu1 %v478_v43 }
 0x14d   :  { %211 = vmatmul.bf16.vlgmr.msra.gmra.mxu3 %v200_v45 }
 0x1d0   :  { %v212_v46 = vpop.f32.mrf.mxu3 }
 0x1d1   :  { %v217_v47 = vrot.slane %v212_v46, 6 }
 0x1d3   :  { %v219_v48 = vadd.f32 %v217_v47, %v718_v33 }
 0x1d5   :  { %538 = vtanh.f32 %v219_v48 }
 0x1d8   :  { %v214_v49 = vpop.f32.mrf.mxu3 }
 0x1db   :  { %v539_v50 = vpop.eup %538 }
 0x1dc   :  { %v221_v51 = vpack.c.bf16 %v539_v50, %v539_v50 }
 0x1de   :  { %v223_v52 = vrot.slane %v221_v51, 1  ;;  %v357_v51 = vld [vmem:[%s737_s3 + $0x1] sm:$0x1] }
 0x1e0   :  { %233 = vmatmul.bf16.vlgmr.msrb.gmra.mxu0 %v223_v52 }
 0x25d   :  { %v234_v53 = vpop.f32.mrf.mxu0 }
 0x25e   :  { %v239_v54 = vrot.slane %v234_v53, 5 }
 0x260   :  { %v241_v55 = vadd.f32 %v239_v54, %v718_v33 }
 0x262   :  { %540 = vtanh.f32 %v241_v55 }
 0x265   :  { %v236_v56 = vpop.f32.mrf.mxu0 }
 0x268   :  { %v541_v57 = vpop.eup %540 }
 0x269   :  { %v243_v58 = vpack.c.bf16 %v541_v57, %v541_v57 }
 0x26b   :  { %v245_v59 = vshrl.u32 %v243_v58, 16 }
 0x26d   :  { %v247_v60 = vrot.slane %v245_v59, 1 }
 0x26f   :  { %257 = vmatmul.bf16.vlgmr.msrb.gmra.mxu1 %v247_v60 }
 0x2ec   :  { %v258_v61 = vpop.f32.mrf.mxu1 }
 0x2ed   :  { %v263_v62 = vrot.slane %v258_v61, 4 }
 0x2ef   :  { %v265_v63 = vadd.f32 %v263_v62, %v718_v33 }
 0x2f1   :  { %542 = vtanh.f32 %v265_v63 }
 0x2f4   :  { %v260_v0 = vpop.f32.mrf.mxu1 }
 0x2f7   :  { %v543_v1 = vpop.eup %542 }
 0x2f8   :  { %v267_v2 = vpack.c.bf16 %v543_v1, %v543_v1 }
 0x2fa   :  { %v269_v3 = vrot.slane %v267_v2, 2 }
 0x2fc   :  { %279 = vmatmul.bf16.vlgmr.msrb.gmra.mxu2 %v269_v3 }
 0x37f   :  { %v280_v4 = vpop.f32.mrf.mxu2 }
 0x380   :  { %v285_v5 = vrot.slane %v280_v4, 3 }
 0x382   :  { %v287_v6 = vadd.f32 %v285_v5, %v718_v33 }
 0x384   :  { %544 = vtanh.f32 %v287_v6 }
 0x387   :  { %v282_v7 = vpop.f32.mrf.mxu2 }
 0x38a   :  { %v545_v8 = vpop.eup %544 }
 0x38b   :  { %v289_v9 = vpack.c.bf16 %v545_v8, %v545_v8 }
 0x38d   :  { %v291_v10 = vshrl.u32 %v289_v9, 16 }
 0x38f   :  { %v293_v11 = vrot.slane %v291_v10, 2 }
 0x391   :  { %303 = vmatmul.bf16.vlgmr.msrb.gmra.mxu3 %v293_v11 }
 0x414   :  { %v304_v21 = vpop.f32.mrf.mxu3 }
 0x415   :  { %v309_v22 = vrot.slane %v304_v21, 2 }
 0x417   :  { %v311_v23 = vadd.f32 %v309_v22, %v718_v33 }
 0x419   :  { %546 = vtanh.f32 %v311_v23 }
 0x41c   :  { %v306_v24 = vpop.f32.mrf.mxu3 }
 0x41f   :  { %v547_v25 = vpop.eup %546 }
 0x420   :  { %v313_v26 = vpack.c.bf16 %v547_v25, %v547_v25 }
 0x422   :  { %v315_v27 = vrot.slane %v313_v26, 3 }
 0x424   :  { %325 = vmatmul.bf16.vlgmr.msra.gmra.mxu0 %v315_v27 }
 0x4a1   :  { %v326_v44 = vpop.f32.mrf.mxu0 }
 0x4a2   :  { %v331_v45 = vrot.slane %v326_v44, 1 }
 0x4a4   :  { %v333_v46 = vadd.f32 %v331_v45, %v718_v33 }
 0x4a6   :  { %548 = vtanh.f32 %v333_v46 }
 0x4a9   :  { %v328_v47 = vpop.f32.mrf.mxu0 }
 0x4ac   :  { %v549_v48 = vpop.eup %548 }
 0x4ad   :  { %335 = vst [vmem:[#allocation2 - $0x7] sm:$0x80] %v549_v48 }
 0x4b4   :  { %v355_v49 = vld [vmem:[#allocation2] sm:$0x1] }
 0x4b5   :  { %v356_v50 = vpack.c.bf16 %v355_v49, %v355_v49 }
 0x4b7   :  { %414 = vmatmul.bf16.vlgmr.msra.gmra.mxu1 %v356_v50 }
 0x534   :  { %v415_v52 = vpop.f32.mrf.mxu1 }
 0x535   :  { %v416_v53 = vadd.f32 %v415_v52, %v357_v51 }
 0x537   :  { %419 = vst [vmem:[#allocation9] sm:$0x1] %v416_v53 }
 0x538   :  { %430 = dma.vmem_to_hbm [thread:$0]  %s426_s10, 16, %s428_s13, [#allocation5]  }
 0x53c   :  { %v417_v33 = vpop.f32.mrf.mxu1 }
 0x53d   :  { %650 = dma.done.wait [#allocation5], 16  }
 0x53e   :  { %651 = vsyncadd [#allocation5], 4294967280 }
 0x53f   :  { %435 = vsyncpa [#allocation4], 1 }
 0x540   :  { %436 = vsyncpa [#allocation7], 1 }
 0x541   :  { %437 = vsyncpa [#allocation5], 1 }

</bundles_post_ra>
